<compile_context>
chip_gen: v5e
topology: v5e:2x2
jax: 0.10.0
libtpu: 0.0.40
codegen_flags: <defaults>
</compile_context>

<pallas_src>
import functools

import jax
import jax.numpy as jnp
from jax.experimental import pallas as pl
from jax.experimental.pallas import tpu as pltpu


def _tscorr_kernel(x_ref, o_ref, *, size, win, pairs, eps):
    # x_ref: (TB, F, L) batch tile; o_ref: (TB, P, win) stride-1 correlations.
    x = x_ref[...].astype(jnp.float32)
    inv_n = 1.0 / float(size)

    # Numerical-stability shift: the centered window sums are invariant to a
    # per-feature constant shift, so remove the global mean before the
    # one-pass formula (cheap: F reductions over L lanes, done once per tile).
    x = x - jnp.mean(x, axis=-1, keepdims=True)

    # Running sum of `size` lane-shifted views: (.., L) -> (.., win).
    # Pure VPU adds; unroll is over `size`, never over out_len.
    # (For very large `size`, chunk this with lax.fori_loop(unroll=True) or a
    #  two-pass block-prefix scheme; unnecessary at these window sizes.)
    def sliding_sum(v):
        acc = v[..., 0:win]
        for k in range(1, size):
            acc = acc + v[..., k:k + win]
        return acc

    s1 = sliding_sum(x)                      # (TB, F, win)  window sums
    s2 = sliding_sum(x * x)                  # (TB, F, win)  window sums of squares
    ssq = s2 - s1 * s1 * inv_n               # centered sum of squares
    dnm = jnp.sqrt(jnp.maximum(ssq, 0.0))    # per-feature sqrt(sum c^2)

    # Static unroll over feature pairs (P = F*(F-1)//2 is inherent to the op);
    # order matches the PyTorch k counter (i outer, j = i+1..F-1).
    for p, (i, j) in enumerate(pairs):
        cross = sliding_sum(x[:, i, :] * x[:, j, :])            # (TB, win)
        num = cross - s1[:, i, :] * s1[:, j, :] * inv_n
        den = dnm[:, i, :] * dnm[:, j, :] + eps
        o_ref[:, p, :] = (num / den).astype(o_ref.dtype)


def _pick_batch_tile(B, F, L, P, win):
    """Batch-tile size: fill a conservative VMEM budget, keep >= 2 grid steps."""
    # f32 input tile + output tile + ~3x intermediates, double-buffered by Pallas.
    per_batch_bytes = 4 * (F * L + P * win) * 5
    budget = 8 * 1024 * 1024          # safe under v5e/v6e/v7x scoped-VMEM limits
    tb = max(1, min(B, budget // max(per_batch_bytes, 1)))
    if B >= 2:                        # >= 2 grid steps so both cores get work
        tb = min(tb, pl.cdiv(B, 2))
    while B % tb != 0:                # keep blocks exact (no ragged edge)
        tb -= 1
    return tb


def ts_corr(x, size, stride, eps=1e-8):
    """x: (B, F, L) -> (B, F*(F-1)//2, out_L) float32 rolling correlation."""
    B, F, L = x.shape
    if size < 1 or stride < 1:
        raise ValueError("size and stride must be >= 1")
    if L < size:
        raise ValueError(f"seq_length ({L}) must be >= size ({size})")
    out_len = (L - size) // stride + 1
    win = L - size + 1                        # stride-1 window count
    pairs = tuple((i, j) for i in range(F) for j in range(i + 1, F))
    P = len(pairs)
    if P == 0:
        return jnp.zeros((B, 0, out_len), jnp.float32)

    TB = _pick_batch_tile(B, F, L, P, win)
    grid = (B // TB,)

    kernel = functools.partial(_tscorr_kernel, size=int(size), win=int(win),
                               pairs=pairs, eps=float(eps))

    full = pl.pallas_call(
        kernel,
        out_shape=jax.ShapeDtypeStruct((B, P, win), jnp.float32),
        grid_spec=pltpu.PrefetchScalarGridSpec(
            num_scalar_prefetch=0,
            grid=grid,
            in_specs=[pl.BlockSpec((TB, F, L), lambda b: (b, 0, 0))],
            out_specs=pl.BlockSpec((TB, P, win), lambda b: (b, 0, 0)),
        ),
        compiler_params=pltpu.CompilerParams(
            dimension_semantics=("parallel",),
            vmem_limit_bytes=32 * 1024 * 1024,
        ),
    )(x)

    # One strided downsample outside the kernel handles `stride`; the in-kernel
    # hot loop stays pure VPU and lane-dense (extra stride-1 columns are free).
    if stride == 1:
        return full[..., :out_len]
    return full[..., ::stride][..., :out_len]


def ts_corr_ref(x, size, stride, eps=1e-8):
    """Pure-JAX reference mirroring the PyTorch triple loop."""
    B, F, L = x.shape
    out_len = (L - size) // stride + 1
    rows = []
    for i in range(F):
        for j in range(i + 1, F):
            cols = []
            for t in range(out_len):
                s = t * stride
                si = x[:, i, s:s + size]
                sj = x[:, j, s:s + size]
                ci = si - si.mean(axis=1, keepdims=True)
                cj = sj - sj.mean(axis=1, keepdims=True)
                corr = (ci * cj).sum(axis=1) / (
                    jnp.sqrt((ci ** 2).sum(axis=1))
                    * jnp.sqrt((cj ** 2).sum(axis=1)) + eps)
                cols.append(corr)
            rows.append(jnp.stack(cols, axis=1))
    return jnp.stack(rows, axis=1).astype(jnp.float32)


if __name__ == "__main__":
    key = jax.random.PRNGKey(0)
    B, F, L = 2, 4, 32
    size, stride = 8, 2            # out_L = (32 - 8) // 2 + 1 = 13, pairs P = 6
    x = jax.random.normal(key, (B, F, L), dtype=jnp.float32)

    out = jax.block_until_ready(ts_corr(x, size, stride))
    ref = ts_corr_ref(x, size, stride)

    assert out.shape == ref.shape == (B, F * (F - 1) // 2, 13), (out.shape, ref.shape)
    assert jnp.allclose(out, ref, rtol=1e-4, atol=1e-4), \
        float(jnp.max(jnp.abs(out - ref)))
    print("KERNEL_OK")
</pallas_src>

<mosaic_0001>
module attributes {stable_mosaic.version = 11 : i64} {
  func.func @_tscorr_kernel(%arg0: i32, %arg1: memref<1x4x32xf32, #tpu.memory_space<vmem>>, %arg2: memref<1x6x25xf32, #tpu.memory_space<vmem>>) attributes {dimension_semantics = [#tpu.dimension_semantics<parallel>], iteration_bounds = array<i64: 2>, scalar_prefetch = 0 : i64, scratch_operands = 0 : i64, tpu.core_type = #tpu.core_type<tc>, window_params = [{transform_indices = @transform_0, window_bounds = array<i64: 1, 4, 32>}, {transform_indices = @transform_1, window_bounds = array<i64: 1, 6, 25>}]} {
    %c0 = arith.constant 0 : index
    %c0_0 = arith.constant 0 : index
    %c0_1 = arith.constant 0 : index
    %0 = vector.load %arg1[%c0, %c0_0, %c0_1] : memref<1x4x32xf32, #tpu.memory_space<vmem>>, vector<1x4x32xf32>
    %cst = arith.constant dense<0.000000e+00> : vector<1x4xf32>
    %1 = vector.multi_reduction <add>, %0, %cst [2] : vector<1x4x32xf32> to vector<1x4xf32>
    %2 = vector.shape_cast %1 : vector<1x4xf32> to vector<1x4x1xf32>
    %cst_2 = arith.constant 3.200000e+01 : f32
    %3 = vector.broadcast %cst_2 : f32 to vector<1x4x1xf32>
    %4 = arith.divf %2, %3 : vector<1x4x1xf32>
    %5 = vector.broadcast %4 : vector<1x4x1xf32> to vector<1x4x32xf32>
    %6 = arith.subf %0, %5 : vector<1x4x32xf32>
    %7 = vector.extract_strided_slice %6 {offsets = [0, 0, 0], sizes = [1, 4, 25], strides = [1, 1, 1]} : vector<1x4x32xf32> to vector<1x4x25xf32>
    %8 = vector.extract_strided_slice %6 {offsets = [0, 0, 1], sizes = [1, 4, 25], strides = [1, 1, 1]} : vector<1x4x32xf32> to vector<1x4x25xf32>
    %9 = arith.addf %7, %8 : vector<1x4x25xf32>
    %10 = vector.extract_strided_slice %6 {offsets = [0, 0, 2], sizes = [1, 4, 25], strides = [1, 1, 1]} : vector<1x4x32xf32> to vector<1x4x25xf32>
    %11 = arith.addf %9, %10 : vector<1x4x25xf32>
    %12 = vector.extract_strided_slice %6 {offsets = [0, 0, 3], sizes = [1, 4, 25], strides = [1, 1, 1]} : vector<1x4x32xf32> to vector<1x4x25xf32>
    %13 = arith.addf %11, %12 : vector<1x4x25xf32>
    %14 = vector.extract_strided_slice %6 {offsets = [0, 0, 4], sizes = [1, 4, 25], strides = [1, 1, 1]} : vector<1x4x32xf32> to vector<1x4x25xf32>
    %15 = arith.addf %13, %14 : vector<1x4x25xf32>
    %16 = vector.extract_strided_slice %6 {offsets = [0, 0, 5], sizes = [1, 4, 25], strides = [1, 1, 1]} : vector<1x4x32xf32> to vector<1x4x25xf32>
    %17 = arith.addf %15, %16 : vector<1x4x25xf32>
    %18 = vector.extract_strided_slice %6 {offsets = [0, 0, 6], sizes = [1, 4, 25], strides = [1, 1, 1]} : vector<1x4x32xf32> to vector<1x4x25xf32>
    %19 = arith.addf %17, %18 : vector<1x4x25xf32>
    %20 = vector.extract_strided_slice %6 {offsets = [0, 0, 7], sizes = [1, 4, 25], strides = [1, 1, 1]} : vector<1x4x32xf32> to vector<1x4x25xf32>
    %21 = arith.addf %19, %20 : vector<1x4x25xf32>
    %22 = arith.mulf %6, %6 : vector<1x4x32xf32>
    %23 = vector.extract_strided_slice %22 {offsets = [0, 0, 0], sizes = [1, 4, 25], strides = [1, 1, 1]} : vector<1x4x32xf32> to vector<1x4x25xf32>
    %24 = vector.extract_strided_slice %22 {offsets = [0, 0, 1], sizes = [1, 4, 25], strides = [1, 1, 1]} : vector<1x4x32xf32> to vector<1x4x25xf32>
    %25 = arith.addf %23, %24 : vector<1x4x25xf32>
    %26 = vector.extract_strided_slice %22 {offsets = [0, 0, 2], sizes = [1, 4, 25], strides = [1, 1, 1]} : vector<1x4x32xf32> to vector<1x4x25xf32>
    %27 = arith.addf %25, %26 : vector<1x4x25xf32>
    %28 = vector.extract_strided_slice %22 {offsets = [0, 0, 3], sizes = [1, 4, 25], strides = [1, 1, 1]} : vector<1x4x32xf32> to vector<1x4x25xf32>
    %29 = arith.addf %27, %28 : vector<1x4x25xf32>
    %30 = vector.extract_strided_slice %22 {offsets = [0, 0, 4], sizes = [1, 4, 25], strides = [1, 1, 1]} : vector<1x4x32xf32> to vector<1x4x25xf32>
    %31 = arith.addf %29, %30 : vector<1x4x25xf32>
    %32 = vector.extract_strided_slice %22 {offsets = [0, 0, 5], sizes = [1, 4, 25], strides = [1, 1, 1]} : vector<1x4x32xf32> to vector<1x4x25xf32>
    %33 = arith.addf %31, %32 : vector<1x4x25xf32>
    %34 = vector.extract_strided_slice %22 {offsets = [0, 0, 6], sizes = [1, 4, 25], strides = [1, 1, 1]} : vector<1x4x32xf32> to vector<1x4x25xf32>
    %35 = arith.addf %33, %34 : vector<1x4x25xf32>
    %36 = vector.extract_strided_slice %22 {offsets = [0, 0, 7], sizes = [1, 4, 25], strides = [1, 1, 1]} : vector<1x4x32xf32> to vector<1x4x25xf32>
    %37 = arith.addf %35, %36 : vector<1x4x25xf32>
    %38 = arith.mulf %21, %21 : vector<1x4x25xf32>
    %cst_3 = arith.constant 1.250000e-01 : f32
    %39 = vector.broadcast %cst_3 : f32 to vector<1x4x25xf32>
    %40 = arith.mulf %38, %39 : vector<1x4x25xf32>
    %41 = arith.subf %37, %40 : vector<1x4x25xf32>
    %cst_4 = arith.constant 0.000000e+00 : f32
    %42 = vector.broadcast %cst_4 : f32 to vector<1x4x25xf32>
    %43 = arith.maximumf %41, %42 : vector<1x4x25xf32>
    %44 = math.sqrt %43 : vector<1x4x25xf32>
    %45 = vector.extract_strided_slice %6 {offsets = [0, 0, 0], sizes = [1, 1, 32], strides = [1, 1, 1]} : vector<1x4x32xf32> to vector<1x1x32xf32>
    %46 = vector.shape_cast %45 : vector<1x1x32xf32> to vector<1x32xf32>
    %47 = vector.extract_strided_slice %6 {offsets = [0, 1, 0], sizes = [1, 1, 32], strides = [1, 1, 1]} : vector<1x4x32xf32> to vector<1x1x32xf32>
    %48 = vector.shape_cast %47 : vector<1x1x32xf32> to vector<1x32xf32>
    %49 = arith.mulf %46, %48 : vector<1x32xf32>
    %50 = vector.extract_strided_slice %49 {offsets = [0, 0], sizes = [1, 25], strides = [1, 1]} : vector<1x32xf32> to vector<1x25xf32>
    %51 = vector.extract_strided_slice %49 {offsets = [0, 1], sizes = [1, 25], strides = [1, 1]} : vector<1x32xf32> to vector<1x25xf32>
    %52 = arith.addf %50, %51 : vector<1x25xf32>
    %53 = vector.extract_strided_slice %49 {offsets = [0, 2], sizes = [1, 25], strides = [1, 1]} : vector<1x32xf32> to vector<1x25xf32>
    %54 = arith.addf %52, %53 : vector<1x25xf32>
    %55 = vector.extract_strided_slice %49 {offsets = [0, 3], sizes = [1, 25], strides = [1, 1]} : vector<1x32xf32> to vector<1x25xf32>
    %56 = arith.addf %54, %55 : vector<1x25xf32>
    %57 = vector.extract_strided_slice %49 {offsets = [0, 4], sizes = [1, 25], strides = [1, 1]} : vector<1x32xf32> to vector<1x25xf32>
    %58 = arith.addf %56, %57 : vector<1x25xf32>
    %59 = vector.extract_strided_slice %49 {offsets = [0, 5], sizes = [1, 25], strides = [1, 1]} : vector<1x32xf32> to vector<1x25xf32>
    %60 = arith.addf %58, %59 : vector<1x25xf32>
    %61 = vector.extract_strided_slice %49 {offsets = [0, 6], sizes = [1, 25], strides = [1, 1]} : vector<1x32xf32> to vector<1x25xf32>
    %62 = arith.addf %60, %61 : vector<1x25xf32>
    %63 = vector.extract_strided_slice %49 {offsets = [0, 7], sizes = [1, 25], strides = [1, 1]} : vector<1x32xf32> to vector<1x25xf32>
    %64 = arith.addf %62, %63 : vector<1x25xf32>
    %65 = vector.extract_strided_slice %21 {offsets = [0, 0, 0], sizes = [1, 1, 25], strides = [1, 1, 1]} : vector<1x4x25xf32> to vector<1x1x25xf32>
    %66 = vector.shape_cast %65 : vector<1x1x25xf32> to vector<1x25xf32>
    %67 = vector.extract_strided_slice %21 {offsets = [0, 1, 0], sizes = [1, 1, 25], strides = [1, 1, 1]} : vector<1x4x25xf32> to vector<1x1x25xf32>
    %68 = vector.shape_cast %67 : vector<1x1x25xf32> to vector<1x25xf32>
    %69 = arith.mulf %66, %68 : vector<1x25xf32>
    %cst_5 = arith.constant 1.250000e-01 : f32
    %70 = vector.broadcast %cst_5 : f32 to vector<1x25xf32>
    %71 = arith.mulf %69, %70 : vector<1x25xf32>
    %72 = arith.subf %64, %71 : vector<1x25xf32>
    %73 = vector.extract_strided_slice %44 {offsets = [0, 0, 0], sizes = [1, 1, 25], strides = [1, 1, 1]} : vector<1x4x25xf32> to vector<1x1x25xf32>
    %74 = vector.shape_cast %73 : vector<1x1x25xf32> to vector<1x25xf32>
    %75 = vector.extract_strided_slice %44 {offsets = [0, 1, 0], sizes = [1, 1, 25], strides = [1, 1, 1]} : vector<1x4x25xf32> to vector<1x1x25xf32>
    %76 = vector.shape_cast %75 : vector<1x1x25xf32> to vector<1x25xf32>
    %77 = arith.mulf %74, %76 : vector<1x25xf32>
    %cst_6 = arith.constant 9.99999993E-9 : f32
    %78 = vector.broadcast %cst_6 : f32 to vector<1x25xf32>
    %79 = arith.addf %77, %78 : vector<1x25xf32>
    %80 = arith.divf %72, %79 : vector<1x25xf32>
    %c0_7 = arith.constant 0 : index
    %c0_8 = arith.constant 0 : index
    %c0_9 = arith.constant 0 : index
    %81 = vector.load %arg2[%c0_7, %c0_8, %c0_9] : memref<1x6x25xf32, #tpu.memory_space<vmem>>, vector<1x1x25xf32>
    %82 = vector.shape_cast %81 : vector<1x1x25xf32> to vector<1x25xf32>
    %83 = vector.shape_cast %80 : vector<1x25xf32> to vector<1x1x25xf32>
    tpu.vector_store %arg2[%c0_7, %c0_8, %c0_9], %83 {strides = array<i32>} : memref<1x6x25xf32, #tpu.memory_space<vmem>>, vector<1x1x25xf32>,
    %84 = vector.extract_strided_slice %6 {offsets = [0, 0, 0], sizes = [1, 1, 32], strides = [1, 1, 1]} : vector<1x4x32xf32> to vector<1x1x32xf32>
    %85 = vector.shape_cast %84 : vector<1x1x32xf32> to vector<1x32xf32>
    %86 = vector.extract_strided_slice %6 {offsets = [0, 2, 0], sizes = [1, 1, 32], strides = [1, 1, 1]} : vector<1x4x32xf32> to vector<1x1x32xf32>
    %87 = vector.shape_cast %86 : vector<1x1x32xf32> to vector<1x32xf32>
    %88 = arith.mulf %85, %87 : vector<1x32xf32>
    %89 = vector.extract_strided_slice %88 {offsets = [0, 0], sizes = [1, 25], strides = [1, 1]} : vector<1x32xf32> to vector<1x25xf32>
    %90 = vector.extract_strided_slice %88 {offsets = [0, 1], sizes = [1, 25], strides = [1, 1]} : vector<1x32xf32> to vector<1x25xf32>
    %91 = arith.addf %89, %90 : vector<1x25xf32>
    %92 = vector.extract_strided_slice %88 {offsets = [0, 2], sizes = [1, 25], strides = [1, 1]} : vector<1x32xf32> to vector<1x25xf32>
    %93 = arith.addf %91, %92 : vector<1x25xf32>
    %94 = vector.extract_strided_slice %88 {offsets = [0, 3], sizes = [1, 25], strides = [1, 1]} : vector<1x32xf32> to vector<1x25xf32>
    %95 = arith.addf %93, %94 : vector<1x25xf32>
    %96 = vector.extract_strided_slice %88 {offsets = [0, 4], sizes = [1, 25], strides = [1, 1]} : vector<1x32xf32> to vector<1x25xf32>
    %97 = arith.addf %95, %96 : vector<1x25xf32>
    %98 = vector.extract_strided_slice %88 {offsets = [0, 5], sizes = [1, 25], strides = [1, 1]} : vector<1x32xf32> to vector<1x25xf32>
    %99 = arith.addf %97, %98 : vector<1x25xf32>
    %100 = vector.extract_strided_slice %88 {offsets = [0, 6], sizes = [1, 25], strides = [1, 1]} : vector<1x32xf32> to vector<1x25xf32>
    %101 = arith.addf %99, %100 : vector<1x25xf32>
    %102 = vector.extract_strided_slice %88 {offsets = [0, 7], sizes = [1, 25], strides = [1, 1]} : vector<1x32xf32> to vector<1x25xf32>
    %103 = arith.addf %101, %102 : vector<1x25xf32>
    %104 = vector.extract_strided_slice %21 {offsets = [0, 0, 0], sizes = [1, 1, 25], strides = [1, 1, 1]} : vector<1x4x25xf32> to vector<1x1x25xf32>
    %105 = vector.shape_cast %104 : vector<1x1x25xf32> to vector<1x25xf32>
    %106 = vector.extract_strided_slice %21 {offsets = [0, 2, 0], sizes = [1, 1, 25], strides = [1, 1, 1]} : vector<1x4x25xf32> to vector<1x1x25xf32>
    %107 = vector.shape_cast %106 : vector<1x1x25xf32> to vector<1x25xf32>
    %108 = arith.mulf %105, %107 : vector<1x25xf32>
    %cst_10 = arith.constant 1.250000e-01 : f32
    %109 = vector.broadcast %cst_10 : f32 to vector<1x25xf32>
    %110 = arith.mulf %108, %109 : vector<1x25xf32>
    %111 = arith.subf %103, %110 : vector<1x25xf32>
    %112 = vector.extract_strided_slice %44 {offsets = [0, 0, 0], sizes = [1, 1, 25], strides = [1, 1, 1]} : vector<1x4x25xf32> to vector<1x1x25xf32>
    %113 = vector.shape_cast %112 : vector<1x1x25xf32> to vector<1x25xf32>
    %114 = vector.extract_strided_slice %44 {offsets = [0, 2, 0], sizes = [1, 1, 25], strides = [1, 1, 1]} : vector<1x4x25xf32> to vector<1x1x25xf32>
    %115 = vector.shape_cast %114 : vector<1x1x25xf32> to vector<1x25xf32>
    %116 = arith.mulf %113, %115 : vector<1x25xf32>
    %cst_11 = arith.constant 9.99999993E-9 : f32
    %117 = vector.broadcast %cst_11 : f32 to vector<1x25xf32>
    %118 = arith.addf %116, %117 : vector<1x25xf32>
    %119 = arith.divf %111, %118 : vector<1x25xf32>
    %c0_12 = arith.constant 0 : index
    %c1 = arith.constant 1 : index
    %c0_13 = arith.constant 0 : index
    %120 = vector.load %arg2[%c0_12, %c1, %c0_13] : memref<1x6x25xf32, #tpu.memory_space<vmem>>, vector<1x1x25xf32>
    %121 = vector.shape_cast %120 : vector<1x1x25xf32> to vector<1x25xf32>
    %122 = vector.shape_cast %119 : vector<1x25xf32> to vector<1x1x25xf32>
    tpu.vector_store %arg2[%c0_12, %c1, %c0_13], %122 {strides = array<i32>} : memref<1x6x25xf32, #tpu.memory_space<vmem>>, vector<1x1x25xf32>,
    %123 = vector.extract_strided_slice %6 {offsets = [0, 0, 0], sizes = [1, 1, 32], strides = [1, 1, 1]} : vector<1x4x32xf32> to vector<1x1x32xf32>
    %124 = vector.shape_cast %123 : vector<1x1x32xf32> to vector<1x32xf32>
    %125 = vector.extract_strided_slice %6 {offsets = [0, 3, 0], sizes = [1, 1, 32], strides = [1, 1, 1]} : vector<1x4x32xf32> to vector<1x1x32xf32>
    %126 = vector.shape_cast %125 : vector<1x1x32xf32> to vector<1x32xf32>
    %127 = arith.mulf %124, %126 : vector<1x32xf32>
    %128 = vector.extract_strided_slice %127 {offsets = [0, 0], sizes = [1, 25], strides = [1, 1]} : vector<1x32xf32> to vector<1x25xf32>
    %129 = vector.extract_strided_slice %127 {offsets = [0, 1], sizes = [1, 25], strides = [1, 1]} : vector<1x32xf32> to vector<1x25xf32>
    %130 = arith.addf %128, %129 : vector<1x25xf32>
    %131 = vector.extract_strided_slice %127 {offsets = [0, 2], sizes = [1, 25], strides = [1, 1]} : vector<1x32xf32> to vector<1x25xf32>
    %132 = arith.addf %130, %131 : vector<1x25xf32>
    %133 = vector.extract_strided_slice %127 {offsets = [0, 3], sizes = [1, 25], strides = [1, 1]} : vector<1x32xf32> to vector<1x25xf32>
    %134 = arith.addf %132, %133 : vector<1x25xf32>
    %135 = vector.extract_strided_slice %127 {offsets = [0, 4], sizes = [1, 25], strides = [1, 1]} : vector<1x32xf32> to vector<1x25xf32>
    %136 = arith.addf %134, %135 : vector<1x25xf32>
    %137 = vector.extract_strided_slice %127 {offsets = [0, 5], sizes = [1, 25], strides = [1, 1]} : vector<1x32xf32> to vector<1x25xf32>
    %138 = arith.addf %136, %137 : vector<1x25xf32>
    %139 = vector.extract_strided_slice %127 {offsets = [0, 6], sizes = [1, 25], strides = [1, 1]} : vector<1x32xf32> to vector<1x25xf32>
    %140 = arith.addf %138, %139 : vector<1x25xf32>
    %141 = vector.extract_strided_slice %127 {offsets = [0, 7], sizes = [1, 25], strides = [1, 1]} : vector<1x32xf32> to vector<1x25xf32>
    %142 = arith.addf %140, %141 : vector<1x25xf32>
    %143 = vector.extract_strided_slice %21 {offsets = [0, 0, 0], sizes = [1, 1, 25], strides = [1, 1, 1]} : vector<1x4x25xf32> to vector<1x1x25xf32>
    %144 = vector.shape_cast %143 : vector<1x1x25xf32> to vector<1x25xf32>
    %145 = vector.extract_strided_slice %21 {offsets = [0, 3, 0], sizes = [1, 1, 25], strides = [1, 1, 1]} : vector<1x4x25xf32> to vector<1x1x25xf32>
    %146 = vector.shape_cast %145 : vector<1x1x25xf32> to vector<1x25xf32>
    %147 = arith.mulf %144, %146 : vector<1x25xf32>
    %cst_14 = arith.constant 1.250000e-01 : f32
    %148 = vector.broadcast %cst_14 : f32 to vector<1x25xf32>
    %149 = arith.mulf %147, %148 : vector<1x25xf32>
    %150 = arith.subf %142, %149 : vector<1x25xf32>
    %151 = vector.extract_strided_slice %44 {offsets = [0, 0, 0], sizes = [1, 1, 25], strides = [1, 1, 1]} : vector<1x4x25xf32> to vector<1x1x25xf32>
    %152 = vector.shape_cast %151 : vector<1x1x25xf32> to vector<1x25xf32>
    %153 = vector.extract_strided_slice %44 {offsets = [0, 3, 0], sizes = [1, 1, 25], strides = [1, 1, 1]} : vector<1x4x25xf32> to vector<1x1x25xf32>
    %154 = vector.shape_cast %153 : vector<1x1x25xf32> to vector<1x25xf32>
    %155 = arith.mulf %152, %154 : vector<1x25xf32>
    %cst_15 = arith.constant 9.99999993E-9 : f32
    %156 = vector.broadcast %cst_15 : f32 to vector<1x25xf32>
    %157 = arith.addf %155, %156 : vector<1x25xf32>
    %158 = arith.divf %150, %157 : vector<1x25xf32>
    %c0_16 = arith.constant 0 : index
    %c2 = arith.constant 2 : index
    %c0_17 = arith.constant 0 : index
    %159 = vector.load %arg2[%c0_16, %c2, %c0_17] : memref<1x6x25xf32, #tpu.memory_space<vmem>>, vector<1x1x25xf32>
    %160 = vector.shape_cast %159 : vector<1x1x25xf32> to vector<1x25xf32>
    %161 = vector.shape_cast %158 : vector<1x25xf32> to vector<1x1x25xf32>
    tpu.vector_store %arg2[%c0_16, %c2, %c0_17], %161 {strides = array<i32>} : memref<1x6x25xf32, #tpu.memory_space<vmem>>, vector<1x1x25xf32>,
    %162 = vector.extract_strided_slice %6 {offsets = [0, 1, 0], sizes = [1, 1, 32], strides = [1, 1, 1]} : vector<1x4x32xf32> to vector<1x1x32xf32>
    %163 = vector.shape_cast %162 : vector<1x1x32xf32> to vector<1x32xf32>
    %164 = vector.extract_strided_slice %6 {offsets = [0, 2, 0], sizes = [1, 1, 32], strides = [1, 1, 1]} : vector<1x4x32xf32> to vector<1x1x32xf32>
    %165 = vector.shape_cast %164 : vector<1x1x32xf32> to vector<1x32xf32>
    %166 = arith.mulf %163, %165 : vector<1x32xf32>
    %167 = vector.extract_strided_slice %166 {offsets = [0, 0], sizes = [1, 25], strides = [1, 1]} : vector<1x32xf32> to vector<1x25xf32>
    %168 = vector.extract_strided_slice %166 {offsets = [0, 1], sizes = [1, 25], strides = [1, 1]} : vector<1x32xf32> to vector<1x25xf32>
    %169 = arith.addf %167, %168 : vector<1x25xf32>
    %170 = vector.extract_strided_slice %166 {offsets = [0, 2], sizes = [1, 25], strides = [1, 1]} : vector<1x32xf32> to vector<1x25xf32>
    %171 = arith.addf %169, %170 : vector<1x25xf32>
    %172 = vector.extract_strided_slice %166 {offsets = [0, 3], sizes = [1, 25], strides = [1, 1]} : vector<1x32xf32> to vector<1x25xf32>
    %173 = arith.addf %171, %172 : vector<1x25xf32>
    %174 = vector.extract_strided_slice %166 {offsets = [0, 4], sizes = [1, 25], strides = [1, 1]} : vector<1x32xf32> to vector<1x25xf32>
    %175 = arith.addf %173, %174 : vector<1x25xf32>
    %176 = vector.extract_strided_slice %166 {offsets = [0, 5], sizes = [1, 25], strides = [1, 1]} : vector<1x32xf32> to vector<1x25xf32>
    %177 = arith.addf %175, %176 : vector<1x25xf32>
    %178 = vector.extract_strided_slice %166 {offsets = [0, 6], sizes = [1, 25], strides = [1, 1]} : vector<1x32xf32> to vector<1x25xf32>
    %179 = arith.addf %177, %178 : vector<1x25xf32>
    %180 = vector.extract_strided_slice %166 {offsets = [0, 7], sizes = [1, 25], strides = [1, 1]} : vector<1x32xf32> to vector<1x25xf32>
    %181 = arith.addf %179, %180 : vector<1x25xf32>
    %182 = vector.extract_strided_slice %21 {offsets = [0, 1, 0], sizes = [1, 1, 25], strides = [1, 1, 1]} : vector<1x4x25xf32> to vector<1x1x25xf32>
    %183 = vector.shape_cast %182 : vector<1x1x25xf32> to vector<1x25xf32>
    %184 = vector.extract_strided_slice %21 {offsets = [0, 2, 0], sizes = [1, 1, 25], strides = [1, 1, 1]} : vector<1x4x25xf32> to vector<1x1x25xf32>
    %185 = vector.shape_cast %184 : vector<1x1x25xf32> to vector<1x25xf32>
    %186 = arith.mulf %183, %185 : vector<1x25xf32>
    %cst_18 = arith.constant 1.250000e-01 : f32
    %187 = vector.broadcast %cst_18 : f32 to vector<1x25xf32>
    %188 = arith.mulf %186, %187 : vector<1x25xf32>
    %189 = arith.subf %181, %188 : vector<1x25xf32>
    %190 = vector.extract_strided_slice %44 {offsets = [0, 1, 0], sizes = [1, 1, 25], strides = [1, 1, 1]} : vector<1x4x25xf32> to vector<1x1x25xf32>
    %191 = vector.shape_cast %190 : vector<1x1x25xf32> to vector<1x25xf32>
    %192 = vector.extract_strided_slice %44 {offsets = [0, 2, 0], sizes = [1, 1, 25], strides = [1, 1, 1]} : vector<1x4x25xf32> to vector<1x1x25xf32>
    %193 = vector.shape_cast %192 : vector<1x1x25xf32> to vector<1x25xf32>
    %194 = arith.mulf %191, %193 : vector<1x25xf32>
    %cst_19 = arith.constant 9.99999993E-9 : f32
    %195 = vector.broadcast %cst_19 : f32 to vector<1x25xf32>
    %196 = arith.addf %194, %195 : vector<1x25xf32>
    %197 = arith.divf %189, %196 : vector<1x25xf32>
    %c0_20 = arith.constant 0 : index
    %c3 = arith.constant 3 : index
    %c0_21 = arith.constant 0 : index
    %198 = vector.load %arg2[%c0_20, %c3, %c0_21] : memref<1x6x25xf32, #tpu.memory_space<vmem>>, vector<1x1x25xf32>
    %199 = vector.shape_cast %198 : vector<1x1x25xf32> to vector<1x25xf32>
    %200 = vector.shape_cast %197 : vector<1x25xf32> to vector<1x1x25xf32>
    tpu.vector_store %arg2[%c0_20, %c3, %c0_21], %200 {strides = array<i32>} : memref<1x6x25xf32, #tpu.memory_space<vmem>>, vector<1x1x25xf32>,
    %201 = vector.extract_strided_slice %6 {offsets = [0, 1, 0], sizes = [1, 1, 32], strides = [1, 1, 1]} : vector<1x4x32xf32> to vector<1x1x32xf32>
    %202 = vector.shape_cast %201 : vector<1x1x32xf32> to vector<1x32xf32>
    %203 = vector.extract_strided_slice %6 {offsets = [0, 3, 0], sizes = [1, 1, 32], strides = [1, 1, 1]} : vector<1x4x32xf32> to vector<1x1x32xf32>
    %204 = vector.shape_cast %203 : vector<1x1x32xf32> to vector<1x32xf32>
    %205 = arith.mulf %202, %204 : vector<1x32xf32>
    %206 = vector.extract_strided_slice %205 {offsets = [0, 0], sizes = [1, 25], strides = [1, 1]} : vector<1x32xf32> to vector<1x25xf32>
    %207 = vector.extract_strided_slice %205 {offsets = [0, 1], sizes = [1, 25], strides = [1, 1]} : vector<1x32xf32> to vector<1x25xf32>
    %208 = arith.addf %206, %207 : vector<1x25xf32>
    %209 = vector.extract_strided_slice %205 {offsets = [0, 2], sizes = [1, 25], strides = [1, 1]} : vector<1x32xf32> to vector<1x25xf32>
    %210 = arith.addf %208, %209 : vector<1x25xf32>
    %211 = vector.extract_strided_slice %205 {offsets = [0, 3], sizes = [1, 25], strides = [1, 1]} : vector<1x32xf32> to vector<1x25xf32>
    %212 = arith.addf %210, %211 : vector<1x25xf32>
    %213 = vector.extract_strided_slice %205 {offsets = [0, 4], sizes = [1, 25], strides = [1, 1]} : vector<1x32xf32> to vector<1x25xf32>
    %214 = arith.addf %212, %213 : vector<1x25xf32>
    %215 = vector.extract_strided_slice %205 {offsets = [0, 5], sizes = [1, 25], strides = [1, 1]} : vector<1x32xf32> to vector<1x25xf32>
    %216 = arith.addf %214, %215 : vector<1x25xf32>
    %217 = vector.extract_strided_slice %205 {offsets = [0, 6], sizes = [1, 25], strides = [1, 1]} : vector<1x32xf32> to vector<1x25xf32>
    %218 = arith.addf %216, %217 : vector<1x25xf32>
    %219 = vector.extract_strided_slice %205 {offsets = [0, 7], sizes = [1, 25], strides = [1, 1]} : vector<1x32xf32> to vector<1x25xf32>
    %220 = arith.addf %218, %219 : vector<1x25xf32>
    %221 = vector.extract_strided_slice %21 {offsets = [0, 1, 0], sizes = [1, 1, 25], strides = [1, 1, 1]} : vector<1x4x25xf32> to vector<1x1x25xf32>
    %222 = vector.shape_cast %221 : vector<1x1x25xf32> to vector<1x25xf32>
    %223 = vector.extract_strided_slice %21 {offsets = [0, 3, 0], sizes = [1, 1, 25], strides = [1, 1, 1]} : vector<1x4x25xf32> to vector<1x1x25xf32>
    %224 = vector.shape_cast %223 : vector<1x1x25xf32> to vector<1x25xf32>
    %225 = arith.mulf %222, %224 : vector<1x25xf32>
    %cst_22 = arith.constant 1.250000e-01 : f32
    %226 = vector.broadcast %cst_22 : f32 to vector<1x25xf32>
    %227 = arith.mulf %225, %226 : vector<1x25xf32>
    %228 = arith.subf %220, %227 : vector<1x25xf32>
    %229 = vector.extract_strided_slice %44 {offsets = [0, 1, 0], sizes = [1, 1, 25], strides = [1, 1, 1]} : vector<1x4x25xf32> to vector<1x1x25xf32>
    %230 = vector.shape_cast %229 : vector<1x1x25xf32> to vector<1x25xf32>
    %231 = vector.extract_strided_slice %44 {offsets = [0, 3, 0], sizes = [1, 1, 25], strides = [1, 1, 1]} : vector<1x4x25xf32> to vector<1x1x25xf32>
    %232 = vector.shape_cast %231 : vector<1x1x25xf32> to vector<1x25xf32>
    %233 = arith.mulf %230, %232 : vector<1x25xf32>
    %cst_23 = arith.constant 9.99999993E-9 : f32
    %234 = vector.broadcast %cst_23 : f32 to vector<1x25xf32>
    %235 = arith.addf %233, %234 : vector<1x25xf32>
    %236 = arith.divf %228, %235 : vector<1x25xf32>
    %c0_24 = arith.constant 0 : index
    %c4 = arith.constant 4 : index
    %c0_25 = arith.constant 0 : index
    %237 = vector.load %arg2[%c0_24, %c4, %c0_25] : memref<1x6x25xf32, #tpu.memory_space<vmem>>, vector<1x1x25xf32>
    %238 = vector.shape_cast %237 : vector<1x1x25xf32> to vector<1x25xf32>
    %239 = vector.shape_cast %236 : vector<1x25xf32> to vector<1x1x25xf32>
    tpu.vector_store %arg2[%c0_24, %c4, %c0_25], %239 {strides = array<i32>} : memref<1x6x25xf32, #tpu.memory_space<vmem>>, vector<1x1x25xf32>,
    %240 = vector.extract_strided_slice %6 {offsets = [0, 2, 0], sizes = [1, 1, 32], strides = [1, 1, 1]} : vector<1x4x32xf32> to vector<1x1x32xf32>
    %241 = vector.shape_cast %240 : vector<1x1x32xf32> to vector<1x32xf32>
    %242 = vector.extract_strided_slice %6 {offsets = [0, 3, 0], sizes = [1, 1, 32], strides = [1, 1, 1]} : vector<1x4x32xf32> to vector<1x1x32xf32>
    %243 = vector.shape_cast %242 : vector<1x1x32xf32> to vector<1x32xf32>
    %244 = arith.mulf %241, %243 : vector<1x32xf32>
    %245 = vector.extract_strided_slice %244 {offsets = [0, 0], sizes = [1, 25], strides = [1, 1]} : vector<1x32xf32> to vector<1x25xf32>
    %246 = vector.extract_strided_slice %244 {offsets = [0, 1], sizes = [1, 25], strides = [1, 1]} : vector<1x32xf32> to vector<1x25xf32>
    %247 = arith.addf %245, %246 : vector<1x25xf32>
    %248 = vector.extract_strided_slice %244 {offsets = [0, 2], sizes = [1, 25], strides = [1, 1]} : vector<1x32xf32> to vector<1x25xf32>
    %249 = arith.addf %247, %248 : vector<1x25xf32>
    %250 = vector.extract_strided_slice %244 {offsets = [0, 3], sizes = [1, 25], strides = [1, 1]} : vector<1x32xf32> to vector<1x25xf32>
    %251 = arith.addf %249, %250 : vector<1x25xf32>
    %252 = vector.extract_strided_slice %244 {offsets = [0, 4], sizes = [1, 25], strides = [1, 1]} : vector<1x32xf32> to vector<1x25xf32>
    %253 = arith.addf %251, %252 : vector<1x25xf32>
    %254 = vector.extract_strided_slice %244 {offsets = [0, 5], sizes = [1, 25], strides = [1, 1]} : vector<1x32xf32> to vector<1x25xf32>
    %255 = arith.addf %253, %254 : vector<1x25xf32>
    %256 = vector.extract_strided_slice %244 {offsets = [0, 6], sizes = [1, 25], strides = [1, 1]} : vector<1x32xf32> to vector<1x25xf32>
    %257 = arith.addf %255, %256 : vector<1x25xf32>
    %258 = vector.extract_strided_slice %244 {offsets = [0, 7], sizes = [1, 25], strides = [1, 1]} : vector<1x32xf32> to vector<1x25xf32>
    %259 = arith.addf %257, %258 : vector<1x25xf32>
    %260 = vector.extract_strided_slice %21 {offsets = [0, 2, 0], sizes = [1, 1, 25], strides = [1, 1, 1]} : vector<1x4x25xf32> to vector<1x1x25xf32>
    %261 = vector.shape_cast %260 : vector<1x1x25xf32> to vector<1x25xf32>
    %262 = vector.extract_strided_slice %21 {offsets = [0, 3, 0], sizes = [1, 1, 25], strides = [1, 1, 1]} : vector<1x4x25xf32> to vector<1x1x25xf32>
    %263 = vector.shape_cast %262 : vector<1x1x25xf32> to vector<1x25xf32>
    %264 = arith.mulf %261, %263 : vector<1x25xf32>
    %cst_26 = arith.constant 1.250000e-01 : f32
    %265 = vector.broadcast %cst_26 : f32 to vector<1x25xf32>
    %266 = arith.mulf %264, %265 : vector<1x25xf32>
    %267 = arith.subf %259, %266 : vector<1x25xf32>
    %268 = vector.extract_strided_slice %44 {offsets = [0, 2, 0], sizes = [1, 1, 25], strides = [1, 1, 1]} : vector<1x4x25xf32> to vector<1x1x25xf32>
    %269 = vector.shape_cast %268 : vector<1x1x25xf32> to vector<1x25xf32>
    %270 = vector.extract_strided_slice %44 {offsets = [0, 3, 0], sizes = [1, 1, 25], strides = [1, 1, 1]} : vector<1x4x25xf32> to vector<1x1x25xf32>
    %271 = vector.shape_cast %270 : vector<1x1x25xf32> to vector<1x25xf32>
    %272 = arith.mulf %269, %271 : vector<1x25xf32>
    %cst_27 = arith.constant 9.99999993E-9 : f32
    %273 = vector.broadcast %cst_27 : f32 to vector<1x25xf32>
    %274 = arith.addf %272, %273 : vector<1x25xf32>
    %275 = arith.divf %267, %274 : vector<1x25xf32>
    %c0_28 = arith.constant 0 : index
    %c5 = arith.constant 5 : index
    %c0_29 = arith.constant 0 : index
    %276 = vector.load %arg2[%c0_28, %c5, %c0_29] : memref<1x6x25xf32, #tpu.memory_space<vmem>>, vector<1x1x25xf32>
    %277 = vector.shape_cast %276 : vector<1x1x25xf32> to vector<1x25xf32>
    %278 = vector.shape_cast %275 : vector<1x25xf32> to vector<1x1x25xf32>
    tpu.vector_store %arg2[%c0_28, %c5, %c0_29], %278 {strides = array<i32>} : memref<1x6x25xf32, #tpu.memory_space<vmem>>, vector<1x1x25xf32>,
    return
  }
  func.func @transform_0(%arg0: i32) -> (i32, i32, i32) {
    %c0_i32 = arith.constant 0 : i32
    %c0_i32_0 = arith.constant 0 : i32
    %c0_i32_1 = arith.constant 0 : i32
    return %arg0, %c0_i32, %c0_i32_0 : i32, i32, i32
  }
  func.func @transform_1(%arg0: i32) -> (i32, i32, i32) {
    %c0_i32 = arith.constant 0 : i32
    %c0_i32_0 = arith.constant 0 : i32
    %c0_i32_1 = arith.constant 0 : i32
    return %arg0, %c0_i32, %c0_i32_0 : i32, i32, i32
  }
}

</mosaic_0001>

<bundles_post_ra>
// kernel: tpu_custom_call.1
= control target key start
LH: loop header
LB: loop body
LE: loop exit
PB: predicated region body
PF: predicated region fallthrough
CT: control target
= control target key end

     0   :  { %6 = vsyncpa [#allocation3], 0  ;;  %s833_s0 = inlined_call_operand.hbm [shape: f32[2,4,32], index: 0, kind: input, shape index: {}]   ;;  %s834_s1 = inlined_call_operand.vmem [shape: f32[2,6,25], index: 1, kind: output, shape index: {}]  }
   0x1   :  { %8 = vsyncpa [#allocation3 + $0x1], 0  ;;  %s618_s6 = smov 0   ;;  %s620_s7 = smov 0  }
   0x2   :  { %s622_s8 = smov 0   ;;  %s624_s9 = smov 0  }
   0x3 LB: > { %s637_s10 = sadd.s32 4294967295, %s598_s9   ;;  %s640_s11 = sadd.s32 1, %s598_s9   ;;  %s598_s9 = sphi %s624_s9, %s841_s9   ;;  %s594_s8 = sphi %s622_s8, %s840_s8   ;;  %s590_s7 = sphi %s620_s7, %s839_s7   ;;  %s586_s6 = sphi %s618_s6, %s838_s6  }
   0x4   : > { %s18_s12 = ssub.s32 %s598_s9, %s640_s11  ;;  %s21_s13 = sadd.s32 1, %s594_s8 }
   0x5   : > { %p19_p0 = scmp.eq.s32.totalorder %s18_s12, 0  ;;  %p28_p1 = scmp.ne.s32.totalorder %s594_s8, %s590_s7 }
   0x6   : > { %p29_p2 = scmp.eq.s32.totalorder %s598_s9, 0  ;;  %p34_p3 = scmp.ne.s32.totalorder %s590_s7, %s586_s6 }
   0x7   : > { %s650_s14 = scalar_select %p19_p0, %s594_s8, %s21_s13  }
   0x8   : > { %p652_p4 = por %p29_p2, %p28_p1  ;;  %p35_p5 = scmp.eq.s32.totalorder %s637_s10, 0 }
   0x9   : > { %p483_p6 = scmp.lt.s32.totalorder %s598_s9, 2  ;;  %s84_s17 = sand.u32 1, %s594_s8  }
   0xa   : > { %p658_p7 = por %p35_p5, %p34_p3  ;;  %s470_s18 = sshll.u32 %s84_s17, 2 }
   0xb   : > { %s471_s19 = sshll.u32 %s598_s9, 2  ;;  %s88_s23 = scalar_lea.vmem [#allocation2], %s470_s18 }
   0xc   : > { %s92_s22 = scalar_lea.hbm %s833_s0, %s471_s19  ;;  %s96_s24 = sshll.u32 %s88_s23, 4  ;;  %s97_s24 = int_to_ptr.vmem [resolvable:$true] %s96_s24 }
   0xd   : > { %s94_s25 = sshll.u32 %s92_s22, 4  ;;  %p669_p8 = pnand %p483_p6, %p652_p4  ;;  %s95_s25 = int_to_ptr.hbm [resolvable:$true] %s94_s25 }
   0xe   : > { %p472_p9 = scmp.ge.s32.totalorder %s598_s9, 1  ;;  %p101_p10 = scmp.lt.s32.totalorder %s598_s9, 3 }
   0xf   : > { %s85_s27 = scalar_lea.sflag [#allocation3], %s84_s17  ;;  %s534_s28 = sshra.s32 %s95_s25, 4  ;;  %s535_s28 = int_to_ptr.hbm [resolvable:$true] %s534_s28 }
  0x10   : > { %s536_s29 = scalar_lea.hbm %s535_s28, 4  ;;  %p538_p12 = pneg %p669_p8 }
  0x11   : > { %p537_p11 = scmp.ne.s32.totalorder %s535_s28, %s536_s29  ;;  %s541_s3 = scalar_lea.hbm %s833_s0, 8 }
  0x12   : > { %p542_p1 = scmp.lt.s32.totalorder %s535_s28, %s833_s0  ;;  %p543_p2 = scmp.lt.s32.totalorder %s541_s3, %s536_s29 }
  0x13   : > { %p539_p13 = pnand %p538_p12, %p537_p11 }
  0x14   : > { %p544_p3 = por %p543_p2, %p542_p1 }
  0x15   : > { %p540_p0 = pneg %p539_p13 }
  0x17   : > { %p545_p4 = pnand %p544_p3, %p540_p0 }
  0x19   : > { %548 = shalt.err (!%p545_p4)
}
  0x1a   : > { %482 = dma.hbm_to_vmem [thread:$0]  (!%p669_p8), %s95_s25, 64, %s97_s24, %s85_s27  }
  0x1b   : > { %p102_p5 = pnand %p472_p9, %p101_p10 }
  0x1c   : > { %s107_s6 = sand.u32 (!%p102_p5), 1, %s590_s7  }
  0x1d   : > { %105 = sbr.rel (%p102_p5) target bundleno = 375 (0x177), region = 24  ;;  %s473_s12 = sshll.u32 (!%p102_p5), %s107_s6, 2 }
  0x1e   : > { %s108_s13 = scalar_lea.sflag (!%p102_p5), [#allocation3], %s107_s6  ;;  %s111_s15 = scalar_lea.vmem (!%p102_p5), [#allocation2], %s473_s12 }
  0x22   : > { %581 = dma.done.wait (%p658_p7), %s108_s13, 64  }
  0x23   : > { %583 = vsyncadd (%p658_p7), %s108_s13, 4294967232  ;;  %vm135_vm0 = vcmask 257024   ;;  %v134_v0 = vld [vmem:[%s111_s15] sm:$0xf]  ;;  %v600_v2 = vmov 32.0   ;;  %s601_s9 = smov 124  }
  0x24   : > { %v136_v1 = vsel %vm135_vm0, %v134_v0, 0.0  ;;  %524 = vrcp.f32 %v600_v2  ;;  %s602_s16 = smov 126   ;;  %s603_s17 = smov 127   ;;  %vm281_vm7 = vcmask 196608   ;;  %vm397_vm13 = vcmask 197633  }
  0x25   : > { %137 = vadd.xlane.f32.xlu0 %v136_v1  ;;  %s604_s18 = smov 123   ;;  %s605_s19 = smov 125   ;;  %vm400_vm14 = vcmask 198658  }
  0x26   : > { %s606_s20 = smov 122   ;;  %s607_s21 = smov 121  }
  0x27   : > { %p130_p6 = scmp.lt.s32.totalorder %s637_s10, 1 }
  0x29   : > { %s843_s10 = smov (!%p130_p6, %s637_s10), 1 }
  0x2a   : > { %v525_v3 = vpop.eup %524  ;;  %s474_s22 = sshll.u32 %s843_s10, 3 }
  0x2b   : > { %v140_v4 = vmul.f32 32.0, %v525_v3  ;;  %vm144_vm1 = vweird.f32 %v525_v3  ;;  %s799_s24 = scalar_lea.vmem %s834_s1, %s474_s22 }
  0x2d   : > { %v141_v5 = vsub.f32 1.0, %v140_v4 }
  0x2f   : > { %v142_v6 = vmul.f32 %v525_v3, %v141_v5 }
  0x31   : > { %v143_v7 = vadd.f32 %v525_v3, %v142_v6 }
  0x33   : > { %v145_v8 = vsel %vm144_vm1, %v525_v3, %v143_v7 }
  0x98   : > { %v138_v9 = vpop.xlane.xlu0 %137 }
  0x99   : > { %v146_v10 = vmul.f32 %v145_v8, %v138_v9 }
  0x9b   : > { %v147_v11 = vsub.f32 %v134_v0, %v146_v10 }
  0x9d   : > { %161 = vrot.lane.b32.xlu2 %v147_v11, %s601_s9  ;;  %153 = vrot.lane.b32.xlu1 %v147_v11, %s602_s16  ;;  %v177_v12 = vmul.f32 %v147_v11, %v147_v11  ;;  %v223_v13 = vrot.slane %v147_v11, 1  ;;  %v283_v15 = vrot.slane %v147_v11, 2  ;;  %v340_v17 = vrot.slane %v147_v11, 3 }
  0x9e   : > { %149 = vrot.lane.b32.xlu0 %v147_v11, %s603_s17 }
  0x9f   : > { %v701_v14 = vmul.f32 %v223_v13, %v147_v11  ;;  %v706_v16 = vmul.f32 %v283_v15, %v147_v11  ;;  %v714_v18 = vmul.f32 %v340_v17, %v147_v11 }
  0xa5   : > { %165 = vrot.lane.b32.xlu2 %v147_v11, %s604_s18  ;;  %157 = vrot.lane.b32.xlu1 %v147_v11, %s605_s19 }
  0xa6   : > { %191 = vrot.lane.b32.xlu0 %v177_v12, %s601_s9 }
  0xad   : > { %169 = vrot.lane.b32.xlu2 %v147_v11, %s606_s20  ;;  %173 = vrot.lane.b32.xlu1 %v147_v11, %s607_s21 }
  0xae   : > { %199 = vrot.lane.b32.xlu0 %v177_v12, %s606_s20 }
  0xb5   : > { %183 = vrot.lane.b32.xlu1 %v177_v12, %s602_s16  ;;  %179 = vrot.lane.b32.xlu2 %v177_v12, %s603_s17 }
  0xb6   : > { %231 = vrot.lane.b32.xlu0 %v701_v14, %s602_s16 }
  0xbd   : > { %187 = vrot.lane.b32.xlu1 %v177_v12, %s605_s19  ;;  %195 = vrot.lane.b32.xlu2 %v177_v12, %s604_s18 }
  0xbe   : > { %291 = vrot.lane.b32.xlu0 %v706_v16, %s602_s16 }
  0xc5   : > { %203 = vrot.lane.b32.xlu1 %v177_v12, %s607_s21  ;;  %227 = vrot.lane.b32.xlu2 %v701_v14, %s603_s17 }
  0xc6   : > { %295 = vrot.lane.b32.xlu0 %v706_v16, %s605_s19 }
  0xcd   : > { %287 = vrot.lane.b32.xlu1 %v706_v16, %s603_s17  ;;  %344 = vrot.lane.b32.xlu2 %v714_v18, %s603_s17 }
  0xce   : > { %299 = vrot.lane.b32.xlu0 %v706_v16, %s601_s9 }
  0xd5   : > { %348 = vrot.lane.b32.xlu1 %v714_v18, %s602_s16  ;;  %235 = vrot.lane.b32.xlu2 %v701_v14, %s605_s19 }
  0xd6   : > { %303 = vrot.lane.b32.xlu0 %v706_v16, %s604_s18 }
  0xdd   : > { %352 = vrot.lane.b32.xlu1 %v714_v18, %s605_s19  ;;  %239 = vrot.lane.b32.xlu2 %v701_v14, %s601_s9 }
  0xde   : > { %307 = vrot.lane.b32.xlu0 %v706_v16, %s606_s20 }
  0xe5   : > { %356 = vrot.lane.b32.xlu1 %v714_v18, %s601_s9  ;;  %243 = vrot.lane.b32.xlu2 %v701_v14, %s604_s18 }
  0xe6   : > { %311 = vrot.lane.b32.xlu0 %v706_v16, %s607_s21 }
  0xed   : > { %360 = vrot.lane.b32.xlu1 %v714_v18, %s604_s18  ;;  %247 = vrot.lane.b32.xlu2 %v701_v14, %s606_s20 }
  0xf5   : > { %364 = vrot.lane.b32.xlu1 %v714_v18, %s606_s20  ;;  %251 = vrot.lane.b32.xlu2 %v701_v14, %s607_s21 }
  0xf7   : > { %v162_v19 = vpop.permute.xlu2 %161 }
  0xfd   : > { %368 = vrot.lane.b32.xlu1 %v714_v18, %s607_s21 }
  0xff   : > { %v166_v20 = vpop.permute.xlu2 %165 }
 0x107   : > { %v170_v21 = vpop.permute.xlu2 %169 }
 0x10f   : > { %v154_v22 = vpop.permute.xlu1 %153  ;;  %v180_v23 = vpop.permute.xlu2 %179 }
 0x110   : > { %v150_v24 = vpop.permute.xlu0 %149  ;;  %v182_v38 = vadd.f32 %v180_v23, %v177_v12 }
 0x111   : > { %v152_v28 = vadd.f32 %v150_v24, %v147_v11 }
 0x113   : > { %v156_v29 = vadd.f32 %v154_v22, %v152_v28 }
 0x117   : > { %v158_v25 = vpop.permute.xlu1 %157  ;;  %v196_v27 = vpop.permute.xlu2 %195 }
 0x118   : > { %v192_v26 = vpop.permute.xlu0 %191  ;;  %v160_v31 = vadd.f32 %v158_v25, %v156_v29 }
 0x11a   : > { %v164_v34 = vadd.f32 %v162_v19, %v160_v31 }
 0x11c   : > { %v168_v36 = vadd.f32 %v166_v20, %v164_v34 }
 0x11e   : > { %v172_v39 = vadd.f32 %v170_v21, %v168_v36 }
 0x11f   : > { %v174_v30 = vpop.permute.xlu1 %173  ;;  %v228_v33 = vpop.permute.xlu2 %227 }
 0x120   : > { %v200_v32 = vpop.permute.xlu0 %199  ;;  %v748_v43 = vadd.f32 %v174_v30, %v172_v39  ;;  %v230_v22 = vadd.f32 %v228_v33, %v701_v14 }
 0x122   : > { %v207_v47 = vmul.f32 %v748_v43, %v748_v43  ;;  %v256_v29 = vrot.slane %v748_v43, 1  ;;  %v315_v30 = vrot.slane %v748_v43, 2 }
 0x124   : > { %v208_v52 = vmul.f32 0.125, %v207_v47  ;;  %v258_v33 = vmul.f32 %v256_v29, %v748_v43  ;;  %v317_v34 = vmul.f32 %v315_v30, %v748_v43 }
 0x127   : > { %v184_v35 = vpop.permute.xlu1 %183  ;;  %v746_v40 = vpop.permute.xlu2 %344 }
 0x128   : > { %v232_v37 = vpop.permute.xlu0 %231  ;;  %v186_v41 = vadd.f32 %v184_v35, %v182_v38 }
 0x12f   : > { %v188_v42 = vpop.permute.xlu1 %187  ;;  %v236_v50 = vpop.permute.xlu2 %235 }
 0x130   : > { %v292_v44 = vpop.permute.xlu0 %291  ;;  %v190_v45 = vadd.f32 %v188_v42, %v186_v41  ;;  %v347_v41 = vadd.f32 %v746_v40, %v714_v18 }
 0x132   : > { %v194_v46 = vadd.f32 %v192_v26, %v190_v45  ;;  %v372_v45 = vrot.slane %v748_v43, 3 }
 0x134   : > { %v198_v48 = vadd.f32 %v196_v27, %v194_v46 }
 0x136   : > { %v202_v49 = vadd.f32 %v200_v32, %v198_v48  ;;  %v259_v48 = vmul.f32 0.125, %v258_v33 }
 0x137   : > { %v204_v51 = vpop.permute.xlu1 %203  ;;  %v240_v58 = vpop.permute.xlu2 %239 }
 0x138   : > { %v206_v53 = vadd.f32 %v204_v51, %v202_v49  ;;  %v296_v54 = vpop.permute.xlu0 %295  ;;  %v318_v49 = vmul.f32 0.125, %v317_v34 }
 0x13a   : > { %v209_v55 = vsub.f32 %v206_v53, %v208_v52 }
 0x13c   : > { %v210_v56 = vmax.f32 %v209_v55, 0.0 }
 0x13e   : > { %526 = vrsqrt.f32 %v210_v56  ;;  %vm218_vm2 = vcmp.eq.f32.partialorder %v210_v56, inf  ;;  %v221_v7 = vand.u32 2147483648, %v210_v56  ;;  %vm220_vm3 = vcmp.eq.f32.partialorder %v210_v56, 0.0 }
 0x13f   : > { %v288_v57 = vpop.permute.xlu1 %287  ;;  %v244_v2 = vpop.permute.xlu2 %243 }
 0x140   : > { %v300_v60 = vpop.permute.xlu0 %299  ;;  %v290_v9 = vadd.f32 %v288_v57, %v706_v16  ;;  %v234_v16 = vadd.f32 %v232_v37, %v230_v22 }
 0x142   : > { %v294_v15 = vadd.f32 %v292_v44, %v290_v9  ;;  %v238_v31 = vadd.f32 %v236_v50, %v234_v16 }
 0x144   : > { %v527_v59 = vpop.eup %526  ;;  %v298_v28 = vadd.f32 %v296_v54, %v294_v15  ;;  %v242_v14 = vadd.f32 %v240_v58, %v238_v31 }
 0x145   : > { %v212_v61 = vmul.f32 %v527_v59, %v210_v56 }
 0x146   : > { %v302_v32 = vadd.f32 %v300_v60, %v298_v28  ;;  %v246_v35 = vadd.f32 %v244_v2, %v242_v14 }
 0x147   : > { %v213_v62 = vmul.f32 %v527_v59, %v212_v61  ;;  %v349_v63 = vpop.permute.xlu1 %348  ;;  %v248_v17 = vpop.permute.xlu2 %247 }
 0x148   : > { %v304_v4 = vpop.permute.xlu0 %303  ;;  %v250_v42 = vadd.f32 %v248_v17, %v246_v35  ;;  %v351_v51 = vadd.f32 %v349_v63, %v347_v41 }
 0x149   : > { %v214_v0 = vmul.f32 0.5, %v213_v62  ;;  %v306_v47 = vadd.f32 %v304_v4, %v302_v32 }
 0x14b   : > { %v215_v1 = vsub.f32 1.5, %v214_v0 }
 0x14d   : > { %v216_v3 = vmul.f32 %v527_v59, %v215_v1 }
 0x14f   : > { %v217_v5 = vmul.f32 %v216_v3, %v210_v56  ;;  %v752_v6 = vpop.permute.xlu1 %352  ;;  %v252_v37 = vpop.permute.xlu2 %251 }
 0x150   : > { %v308_v27 = vpop.permute.xlu0 %307  ;;  %v254_v53 = vadd.f32 %v252_v37, %v250_v42  ;;  %v355_v0 = vadd.f32 %v752_v6, %v351_v51 }
 0x151   : > { %v219_v8 = vsel %vm218_vm2, %v210_v56, %v217_v5  ;;  %v310_v54 = vadd.f32 %v308_v27, %v306_v47 }
 0x152   : > { %v222_v10 = vsel %vm220_vm3, %v221_v7, %v219_v8  ;;  %v260_v3 = vsub.f32 %v254_v53, %v259_v48 }
 0x153   : > { %v262_v11 = vrot.slane %v222_v10, 1  ;;  %v320_v12 = vrot.slane %v222_v10, 2  ;;  %v377_v13 = vrot.slane %v222_v10, 3 }
 0x155   : > { %v264_v19 = vmul.f32 %v262_v11, %v222_v10  ;;  %v322_v20 = vmul.f32 %v320_v12, %v222_v10  ;;  %v379_v21 = vmul.f32 %v377_v13, %v222_v10 }
 0x157   : > { %v756_v23 = vadd.f32 1e-08, %v264_v19  ;;  %v758_v24 = vadd.f32 1e-08, %v322_v20  ;;  %v760_v25 = vpop.permute.xlu1 %356  ;;  %v762_v26 = vadd.f32 1e-08, %v379_v21  ;;  %v374_v20 = vmul.f32 %v372_v45, %v748_v43 }
 0x158   : > { %v312_v18 = vpop.permute.xlu0 %311  ;;  %v359_v15 = vadd.f32 %v760_v25, %v355_v0 }
 0x159   : > { %528 = vrcp.f32 %v756_v23  ;;  %v275_v55 = vand.u32 2147483647, %v756_v23  ;;  %v277_v56 = vand.u32 2147483648, %v756_v23  ;;  %v335_v59 = vand.u32 2147483648, %v758_v24 }
 0x15a   : > { %530 = vrcp.f32 %v758_v24  ;;  %v314_v61 = vadd.f32 %v312_v18, %v310_v54  ;;  %v333_v63 = vand.u32 2147483647, %v758_v24  ;;  %vm271_vm6 = vweird.f32 %v756_v23 }
 0x15b   : > { %532 = vrcp.f32 %v762_v26  ;;  %v278_v2 = vor.u32 1.1754944e-38, %v277_v56  ;;  %vm329_vm9 = vweird.f32 %v758_v24  ;;  %vm276_vm10 = vcmp.eq.f32.partialorder %v275_v55, 8.507059e+37 }
 0x15c   : > { %v336_v8 = vor.u32 1.1754944e-38, %v335_v59  ;;  %v319_v10 = vsub.f32 %v314_v61, %v318_v49  ;;  %vm334_vm12 = vcmp.eq.f32.partialorder %v333_v63, 8.507059e+37  ;;  %v392_v22 = vand.u32 2147483648, %v762_v26 }
 0x15d   : > { %vm386_vm0 = vweird.f32 %v762_v26  ;;  %v375_v43 = vmul.f32 0.125, %v374_v20 }
 0x15e   : > { %v393_v28 = vor.u32 1.1754944e-38, %v392_v22 }
 0x15f   : > { %v529_v36 = vpop.eup %528  ;;  %v361_v38 = vpop.permute.xlu1 %360 }
 0x160   : > { %v531_v39 = vpop.eup %530  ;;  %v267_v44 = vmul.f32 %v529_v36, %v756_v23  ;;  %vm272_vm4 = vweird.f32 %v529_v36  ;;  %v363_v19 = vadd.f32 %v361_v38, %v359_v15 }
 0x161   : > { %v776_v46 = vpop.eup %532  ;;  %v325_v50 = vmul.f32 %v531_v39, %v758_v24  ;;  %vm330_vm5 = vweird.f32 %v531_v39  ;;  %vm273_vm8 = vmor %vm271_vm6, %vm272_vm4  ;;  %v390_v24 = vand.u32 2147483647, %v762_v26 }
 0x162   : > { %v268_v52 = vsub.f32 1.0, %v267_v44  ;;  %v382_v40 = vmul.f32 %v776_v46, %v762_v26  ;;  %vm331_vm11 = vmor %vm329_vm9, %vm330_vm5  ;;  %vm387_vm15 = vweird.f32 %v776_v46 }
 0x163   : > { %v326_v57 = vsub.f32 1.0, %v325_v50  ;;  %vm388_vm1 = vmor %vm386_vm0, %vm387_vm15  ;;  %vm391_vm2 = vcmp.eq.f32.partialorder %v390_v24, 8.507059e+37 }
 0x164   : > { %v269_v58 = vmul.f32 %v529_v36, %v268_v52  ;;  %v383_v60 = vsub.f32 1.0, %v382_v40 }
 0x165   : > { %v327_v62 = vmul.f32 %v531_v39, %v326_v57 }
 0x166   : > { %v270_v1 = vadd.f32 %v529_v36, %v269_v58  ;;  %v384_v9 = vmul.f32 %v776_v46, %v383_v60 }
 0x167   : > { %v328_v4 = vadd.f32 %v531_v39, %v327_v62  ;;  %v365_v5 = vpop.permute.xlu1 %364 }
 0x168   : > { %v274_v7 = vsel %vm273_vm8, %v529_v36, %v270_v1  ;;  %v385_v21 = vadd.f32 %v776_v46, %v384_v9  ;;  %v367_v23 = vadd.f32 %v365_v5, %v363_v19 }
 0x169   : > { %v279_v6 = vsel %vm276_vm10, %v278_v2, %v274_v7  ;;  %v332_v11 = vsel %vm331_vm11, %v531_v39, %v328_v4 }
 0x16a   : > { %v280_v12 = vmul.f32 %v279_v6, %v260_v3  ;;  %v337_v13 = vsel %vm334_vm12, %v336_v8, %v332_v11  ;;  %v389_v27 = vsel %vm388_vm1, %v776_v46, %v385_v21 }
 0x16b   : > { %v338_v17 = vmul.f32 %v337_v13, %v319_v10  ;;  %v394_v30 = vsel %vm391_vm2, %v393_v28, %v389_v27 }
 0x16c   : > { %282 = vst.msk [vmem:[%s799_s24] sm:$0x1] %vm281_vm7, %v280_v12 }
 0x16d   : > { %398 = vst.msk [vmem:[%s799_s24 + $0x2] sm:$0x2] %vm397_vm13, %v280_v12 }
 0x16e   : > { %401 = vst.msk [vmem:[%s799_s24 + $0x3] sm:$0x4] %vm400_vm14, %v280_v12 }
 0x16f   : > { %339 = vst.msk [vmem:[%s799_s24 + $0x1] sm:$0x1] %vm281_vm7, %v338_v17  ;;  %v369_v25 = vpop.permute.xlu1 %368 }
 0x170   : > { %399 = vst.msk [vmem:[%s799_s24 + $0x3] sm:$0x2] %vm397_vm13, %v338_v17  ;;  %v371_v16 = vadd.f32 %v369_v25, %v367_v23 }
 0x172   : > { %v376_v29 = vsub.f32 %v371_v16, %v375_v43 }
 0x174   : > { %v395_v31 = vmul.f32 %v394_v30, %v376_v29 }
 0x176   : > { %396 = vst.msk [vmem:[%s799_s24 + $0x2] sm:$0x1] %vm281_vm7, %v395_v31 }
 0x177 PF: > { %p11_p7 = scmp.ge.s32.totalorder %s640_s11, 4   ;;  %s838_s6 = smov %s590_s7 }
 0x178   : > { %s839_s7 = smov %s594_s8  ;;  %s840_s8 = smov %s650_s14 }
 0x179   : > { %s841_s9 = smov %s640_s11  ;;  %13 = sbr.rel (!%p11_p7) target bundleno = 3 (0x3), region = 64 }
 0x17e   :  { %421 = vsyncpa [#allocation3], 1 }
 0x17f   :  { %423 = vsyncpa [#allocation3 + $0x1], 1 }

</bundles_post_ra>
